<compile_context>
chip_gen: v7x
topology: tpu7x:2x2x1
jax: 0.10.0
libtpu: 0.0.40
codegen_flags: <defaults>
</compile_context>

<pallas_src>
import functools

import jax
import jax.numpy as jnp
from jax.experimental import pallas as pl
from jax.experimental.pallas import tpu as pltpu


def _round_up(n, m):
    return ((n + m - 1) // m) * m


def _cdiv(a, b):
    return -(-a // b)


def _batch_tiling(B):
    """Pick (block_m, b_pad): padding waste <= 8 rows/tile, grid >= 2 when b_pad >= 16."""
    b8 = _round_up(max(B, 1), 8)
    if b8 <= 8:
        return b8, b8
    n_tiles = max(2, _cdiv(b8, 512))              # >=2 tiles -> both TCs on v7x; <=~512 rows/tile
    block_m = _round_up(_cdiv(b8, n_tiles), 8)
    return block_m, n_tiles * block_m


def _dqn_kernel(x_ref, w_ref, b_ref, o_ref, *, s, a, f1p, f2p, ap, r1):
    # Weight slab row layout (r1 = round_up(S,16), bf16 sublane aligned):
    #   rows [0,  s)        : W1  (cols [0, f1p) used)
    #   rows [r1, r1+f1p)   : W2  (cols [0, f2p) used)
    #   rows [r2, r2+f2p)   : W3  (cols [0, ap)  used)
    r2 = r1 + f1p
    r3 = r2 + f2p

    x = x_ref[...]                                   # (bm, S)   bf16, unpadded K
    w1 = w_ref[0:s, 0:f1p]                           # (S, f1p)  bf16
    w2 = w_ref[r1:r2, 0:f2p]                         # (f1p,f2p) bf16
    w3 = w_ref[r2:r3, 0:ap]                          # (f2p,ap)  bf16
    b1 = b_ref[0:1, 0:f1p]                           # f32 biases (no bf16 round-trip)
    b2 = b_ref[1:2, 0:f2p]
    b3 = b_ref[2:3, 0:ap]

    # fc1 + ReLU (f32 accumulate, bf16 operands for the next MXU pass)
    h1 = jnp.dot(x, w1, preferred_element_type=jnp.float32) + b1
    h1 = jnp.maximum(h1, 0.0).astype(jnp.bfloat16)
    # fc2 + ReLU
    h2 = jnp.dot(h1, w2, preferred_element_type=jnp.float32) + b2
    h2 = jnp.maximum(h2, 0.0).astype(jnp.bfloat16)
    # fc3 (no activation); store only the real A columns (narrow f32 writeback)
    out = jnp.dot(h2, w3, preferred_element_type=jnp.float32) + b3
    o_ref[...] = out[:, 0:a]


def pack_dqn_params(w1, b1, w2, b2, w3, b3):
    """One-time packing: weights -> one lane-dense bf16 slab, biases -> small f32 block."""
    S, F1 = w1.shape
    F2 = w2.shape[1]
    A = w3.shape[1]
    f1p = _round_up(F1, 128)
    f2p = _round_up(F2, 128)
    ap = _round_up(A, 128)
    w_cols = max(f1p, f2p, ap)
    r1 = _round_up(S, 16)                            # W2 start, bf16 sublane aligned
    n_rows = r1 + f1p + f2p                          # multiple of 16

    slab = jnp.zeros((n_rows, w_cols), jnp.float32)
    slab = slab.at[0:S, 0:F1].set(w1)
    slab = slab.at[r1:r1 + F1, 0:F2].set(w2)
    slab = slab.at[r1 + f1p:r1 + f1p + F2, 0:A].set(w3)
    slab = slab.astype(jnp.bfloat16)

    biases = jnp.zeros((8, w_cols), jnp.float32)
    biases = biases.at[0, 0:F1].set(b1.reshape(-1))
    biases = biases.at[1, 0:F2].set(b2.reshape(-1))
    biases = biases.at[2, 0:A].set(b3.reshape(-1))

    dims = (S, F1, F2, A, f1p, f2p, ap, r1)
    return slab, biases, dims


@functools.partial(jax.jit, static_argnames=("dims",))
def _dqn_forward_impl(x, slab, biases, dims):
    S, F1, F2, A, f1p, f2p, ap, r1 = dims
    B = x.shape[0]
    block_m, b_pad = _batch_tiling(B)
    grid = b_pad // block_m
    n_rows, w_cols = slab.shape

    x_p = x.astype(jnp.bfloat16)
    if b_pad != B:
        x_p = jnp.pad(x_p, ((0, b_pad - B), (0, 0)))   # batch pad only; K stays unpadded

    kernel = functools.partial(_dqn_kernel, s=S, a=A, f1p=f1p, f2p=f2p, ap=ap, r1=r1)

    flops = 2 * b_pad * (S * f1p + f1p * f2p + f2p * ap)
    bytes_accessed = x_p.size * 2 + slab.size * 2 + biases.size * 4 + b_pad * A * 4

    out = pl.pallas_call(
        kernel,
        out_shape=jax.ShapeDtypeStruct((b_pad, A), jnp.float32),
        grid_spec=pltpu.PrefetchScalarGridSpec(
            num_scalar_prefetch=0,
            grid=(grid,),
            in_specs=[
                # x: last dim = S equals the full array dim (allowed), no lane padding.
                pl.BlockSpec((block_m, S), lambda i: (i, 0)),
                # weight slab: constant index_map -> VMEM-resident across batch tiles.
                pl.BlockSpec((n_rows, w_cols), lambda i: (0, 0)),
                # f32 biases: one tiny DMA, resident across tiles.
                pl.BlockSpec((8, w_cols), lambda i: (0, 0)),
            ],
            # output: last dim = A equals full array dim -> no 8->128 padding writeback.
            out_specs=pl.BlockSpec((block_m, A), lambda i: (i, 0)),
        ),
        compiler_params=pltpu.CompilerParams(
            dimension_semantics=("parallel",),      # batch tiles shard across TCs on v7x
        ),
        cost_estimate=pl.CostEstimate(
            flops=flops, transcendentals=0, bytes_accessed=bytes_accessed),
    )(x_p, slab, biases)

    if b_pad != B:
        out = out[:B]
    return out


def make_dqn_forward(w1, b1, w2, b2, w3, b3):
    """Pack parameters once (hoisted out of the hot path); return forward(x)."""
    slab, biases, dims = pack_dqn_params(w1, b1, w2, b2, w3, b3)

    def forward(x):
        return _dqn_forward_impl(x, slab, biases, dims)

    return forward


def init_linear_params(key, fan_in, fan_out):
    """Deterministic init mimicking nn.Linear default: U(-1/sqrt(fan_in), 1/sqrt(fan_in))."""
    kw, kb = jax.random.split(key)
    bound = 1.0 / jnp.sqrt(jnp.float32(fan_in))
    # Stored as (in, out) — transposed relative to PyTorch's (out, in).
    w = jax.random.uniform(kw, (fan_in, fan_out), jnp.float32, -bound, bound)
    b = jax.random.uniform(kb, (1, fan_out), jnp.float32, -bound, bound)
    return w, b


def _ref_forward_bf16(x, w1, b1, w2, b2, w3, b3):
    """Plain-JAX reference: bf16 MXU operands, f32 accumulation, f32 biases (same recipe)."""
    bf = jnp.bfloat16
    h1 = jnp.dot(x.astype(bf), w1.astype(bf), preferred_element_type=jnp.float32) + b1
    h1 = jnp.maximum(h1, 0.0)
    h2 = jnp.dot(h1.astype(bf), w2.astype(bf), preferred_element_type=jnp.float32) + b2
    h2 = jnp.maximum(h2, 0.0)
    out = jnp.dot(h2.astype(bf), w3.astype(bf), preferred_element_type=jnp.float32) + b3
    return out


if __name__ == "__main__":
    # Small shapes consistent with DQN(state_dim, num_actions, fc1_unit=64, fc2_unit=64)
    batch = 2
    state_dim = 32
    num_actions = 8
    fc1_unit = 64
    fc2_unit = 64

    key = jax.random.PRNGKey(0)
    kx, k1, k2, k3 = jax.random.split(key, 4)

    x = jax.random.normal(kx, (batch, state_dim), jnp.float32)
    w1, b1 = init_linear_params(k1, state_dim, fc1_unit)
    w2, b2 = init_linear_params(k2, fc1_unit, fc2_unit)
    w3, b3 = init_linear_params(k3, fc2_unit, num_actions)

    dqn_forward = make_dqn_forward(w1, b1, w2, b2, w3, b3)

    out = dqn_forward(x)
    jax.block_until_ready(out)
    assert out.shape == (batch, num_actions)

    # Exact-recipe reference (bf16 operands, f32 accumulation, f32 bias) — tight tolerance.
    ref_bf16 = _ref_forward_bf16(x, w1, b1, w2, b2, w3, b3)
    assert jnp.allclose(out, ref_bf16, atol=2e-3, rtol=2e-2), "mismatch vs bf16-matched reference"

    # Full-f32 reference — loose tolerance (bf16 MXU operands vs f32 math).
    ref_f32 = jnp.maximum(x @ w1 + b1, 0.0)
    ref_f32 = jnp.maximum(ref_f32 @ w2 + b2, 0.0)
    ref_f32 = ref_f32 @ w3 + b3
    assert jnp.allclose(out, ref_f32, atol=2e-2, rtol=2e-1), "mismatch vs f32 reference"

    # Exercise the multi-tile (grid >= 2, batch-padded) path with an awkward batch size.
    x_big = jax.random.normal(kx, (13, state_dim), jnp.float32)
    out_big = dqn_forward(x_big)
    jax.block_until_ready(out_big)
    assert out_big.shape == (13, num_actions)
    ref_big = _ref_forward_bf16(x_big, w1, b1, w2, b2, w3, b3)
    assert jnp.allclose(out_big, ref_big, atol=2e-3, rtol=2e-2), "mismatch on padded-batch path"

    print("KERNEL_OK")
</pallas_src>

<mosaic_0001>
module attributes {stable_mosaic.version = 11 : i64} {
  func.func @_dqn_kernel(%arg0: i32, %arg1: memref<8x32xbf16, #tpu.memory_space<vmem>>, %arg2: memref<288x128xbf16, #tpu.memory_space<vmem>>, %arg3: memref<8x128xf32, #tpu.memory_space<vmem>>, %arg4: memref<8x8xf32, #tpu.memory_space<vmem>>) attributes {dimension_semantics = [#tpu.dimension_semantics<parallel>], iteration_bounds = array<i64: 1>, scalar_prefetch = 0 : i64, scratch_operands = 0 : i64, tpu.core_type = #tpu.core_type<tc>, window_params = [{transform_indices = @transform_0, window_bounds = array<i64: 8, 32>}, {pipeline_mode = #tpu.pipeline_mode<synchronous>, transform_indices = @transform_1, window_bounds = array<i64: 288, 128>}, {pipeline_mode = #tpu.pipeline_mode<synchronous>, transform_indices = @transform_2, window_bounds = array<i64: 8, 128>}, {transform_indices = @transform_3, window_bounds = array<i64: 8, 8>}]} {
    %c0 = arith.constant 0 : index
    %c0_0 = arith.constant 0 : index
    %0 = vector.load %arg1[%c0, %c0_0] : memref<8x32xbf16, #tpu.memory_space<vmem>>, vector<8x32xbf16>
    %c0_1 = arith.constant 0 : index
    %c0_2 = arith.constant 0 : index
    %1 = vector.load %arg2[%c0_1, %c0_2] : memref<288x128xbf16, #tpu.memory_space<vmem>>, vector<32x128xbf16>
    %c32 = arith.constant 32 : index
    %c0_3 = arith.constant 0 : index
    %2 = vector.load %arg2[%c32, %c0_3] : memref<288x128xbf16, #tpu.memory_space<vmem>>, vector<128x128xbf16>
    %c160 = arith.constant 160 : index
    %c0_4 = arith.constant 0 : index
    %3 = vector.load %arg2[%c160, %c0_4] : memref<288x128xbf16, #tpu.memory_space<vmem>>, vector<128x128xbf16>
    %c0_5 = arith.constant 0 : index
    %c0_6 = arith.constant 0 : index
    %4 = vector.load %arg3[%c0_5, %c0_6] : memref<8x128xf32, #tpu.memory_space<vmem>>, vector<1x128xf32>
    %c1 = arith.constant 1 : index
    %c0_7 = arith.constant 0 : index
    %5 = vector.load %arg3[%c1, %c0_7] : memref<8x128xf32, #tpu.memory_space<vmem>>, vector<1x128xf32>
    %c2 = arith.constant 2 : index
    %c0_8 = arith.constant 0 : index
    %6 = vector.load %arg3[%c2, %c0_8] : memref<8x128xf32, #tpu.memory_space<vmem>>, vector<1x128xf32>
    %cst = arith.constant dense<0.000000e+00> : vector<8x128xf32>
    %7 = tpu.matmul %0, %1, %cst {dimension_numbers = #tpu.dot_dimension_numbers<[1], [0], [0], [1], [0, 0, 1, 1], [], []>} : vector<8x32xbf16>, vector<32x128xbf16>, vector<8x128xf32> -> vector<8x128xf32>
    %8 = vector.broadcast %4 : vector<1x128xf32> to vector<8x128xf32>
    %9 = arith.addf %7, %8 : vector<8x128xf32>
    %cst_9 = arith.constant 0.000000e+00 : f32
    %10 = vector.broadcast %cst_9 : f32 to vector<8x128xf32>
    %11 = arith.maximumf %9, %10 : vector<8x128xf32>
    %12 = arith.truncf %11 : vector<8x128xf32> to vector<8x128xbf16>
    %cst_10 = arith.constant dense<0.000000e+00> : vector<8x128xf32>
    %13 = tpu.matmul %12, %2, %cst_10 {dimension_numbers = #tpu.dot_dimension_numbers<[1], [0], [0], [1], [0, 0, 1, 1], [], []>} : vector<8x128xbf16>, vector<128x128xbf16>, vector<8x128xf32> -> vector<8x128xf32>
    %14 = vector.broadcast %5 : vector<1x128xf32> to vector<8x128xf32>
    %15 = arith.addf %13, %14 : vector<8x128xf32>
    %cst_11 = arith.constant 0.000000e+00 : f32
    %16 = vector.broadcast %cst_11 : f32 to vector<8x128xf32>
    %17 = arith.maximumf %15, %16 : vector<8x128xf32>
    %18 = arith.truncf %17 : vector<8x128xf32> to vector<8x128xbf16>
    %cst_12 = arith.constant dense<0.000000e+00> : vector<8x128xf32>
    %19 = tpu.matmul %18, %3, %cst_12 {dimension_numbers = #tpu.dot_dimension_numbers<[1], [0], [0], [1], [0, 0, 1, 1], [], []>} : vector<8x128xbf16>, vector<128x128xbf16>, vector<8x128xf32> -> vector<8x128xf32>
    %20 = vector.broadcast %6 : vector<1x128xf32> to vector<8x128xf32>
    %21 = arith.addf %19, %20 : vector<8x128xf32>
    %22 = vector.extract_strided_slice %21 {offsets = [0, 0], sizes = [8, 8], strides = [1, 1]} : vector<8x128xf32> to vector<8x8xf32>
    %c0_13 = arith.constant 0 : index
    %c0_14 = arith.constant 0 : index
    %23 = vector.load %arg4[%c0_13, %c0_14] : memref<8x8xf32, #tpu.memory_space<vmem>>, vector<8x8xf32>
    tpu.vector_store %arg4[%c0_13, %c0_14], %22 {strides = array<i32>} : memref<8x8xf32, #tpu.memory_space<vmem>>, vector<8x8xf32>,
    return
  }
  func.func @transform_0(%arg0: i32) -> (i32, i32) {
    %c0_i32 = arith.constant 0 : i32
    %c0_i32_0 = arith.constant 0 : i32
    return %arg0, %c0_i32 : i32, i32
  }
  func.func @transform_1(%arg0: i32) -> (i32, i32) {
    %c0_i32 = arith.constant 0 : i32
    %c0_i32_0 = arith.constant 0 : i32
    %c0_i32_1 = arith.constant 0 : i32
    return %c0_i32, %c0_i32_0 : i32, i32
  }
  func.func @transform_2(%arg0: i32) -> (i32, i32) {
    %c0_i32 = arith.constant 0 : i32
    %c0_i32_0 = arith.constant 0 : i32
    %c0_i32_1 = arith.constant 0 : i32
    return %c0_i32, %c0_i32_0 : i32, i32
  }
  func.func @transform_3(%arg0: i32) -> (i32, i32) {
    %c0_i32 = arith.constant 0 : i32
    %c0_i32_0 = arith.constant 0 : i32
    return %arg0, %c0_i32 : i32, i32
  }
}

</mosaic_0001>

<bundles_post_ra>
// kernel: _dqn_forward_impl.1
= control target key start
LH: loop header
LB: loop body
LE: loop exit
PB: predicated region body
PF: predicated region fallthrough
CT: control target
= control target key end

     0   :  { %8 = vsyncpa [#allocation3], 0  ;;  %s462_s12 = smov [#allocation2]   ;;  %s538_s0 = inlined_call_operand.vmem [shape: bf16[8,32], index: 0, kind: input, shape index: {}]   ;;  %s539_s1 = inlined_call_operand.hbm [shape: bf16[288,128], index: 1, kind: input, shape index: {}]   ;;  %s540_s2 = inlined_call_operand.vmem [shape: f32[8,128], index: 2, kind: input, shape index: {}]   ;;  %s541_s3 = inlined_call_operand.vmem [shape: f32[8,8], index: 3, kind: output, shape index: {}]  }
   0x1   :  { %s16_s13 = sshll.u32 %s462_s12, 4  ;;  %s438_s16 = scalar_lea.hbm %s539_s1, 2304  ;;  %s17_s13 = int_to_ptr.vmem [resolvable:$true] %s16_s13 }
   0x2   :  { %p439_p0 = scmp.ne.s32.totalorder %s539_s1, %s438_s16  ;;  %p442_p1 = scmp.lt.u32.totalorder %s438_s16, %s539_s1 }
   0x4   :  { %p444_p2 = pnand %p442_p1, %p439_p0 }
   0x6   :  { %447 = shalt.err (!%p444_p2)
}
   0x7   :  { %s448_s21 = scalar_lea.vmem %s17_s13, 2304  ;;  %p453_p4 = scmp.lt.s32.totalorder %s17_s13, %s17_s13 }
   0x8   :  { %p449_p3 = scmp.ne.s32.totalorder %s17_s13, %s448_s21  ;;  %p454_p5 = scmp.lt.s32.totalorder %s448_s21, %s448_s21 }
   0xa   :  { %p455_p6 = por %p454_p5, %p453_p4 }
   0xc   :  { %p456_p7 = pnand %p455_p6, %p449_p3 }
   0xe   :  { %459 = shalt.err (!%p456_p7)
}
   0xf   :  { %s463_s22 = smov 64   ;;  %s464_s23 = smov 4  }
  0x10   :  { %22 = dma.hbm_to_vmem [thread:$0]  %s539_s1, 2304, %s17_s13, [#allocation3], %s463_s22, %s463_s22, %s464_s23  }
  0x11   :  { %460 = dma.done.wait [#allocation3], 2304  }
  0x12   :  { %461 = vsyncadd [#allocation3], 4294964992  ;;  %v465_v0 = vmov 0.0   ;;  %vm466_vm0 = vmmov 0   ;;  %v420_v1 = vld [vmem:[#allocation2] sm:$0xff]   ;;  %v421_v2 = vld [vmem:[#allocation2 + $0x8] sm:$0xff]  }
  0x13   :  { %367 = vmatprep.subr.bf16.mxu0 %v465_v0  ;;  %371 = vmatprep.mubr.msk.bf16.mxu0 %vm466_vm0, %v465_v0  ;;  %v422_v3 = vld [vmem:[#allocation2 + $0x10] sm:$0xff]   ;;  %vm85_vm1 = vcmask 261120   ;;  %v423_v4 = vld [vmem:[#allocation2 + $0x18] sm:$0xff]   ;;  %v424_v6 = vld [vmem:[#allocation2 + $0x20] sm:$0xff]   ;;  %vm317_vm2 = vcmask 64512  }
  0x14   :  { %375 = vmatprep.subr.bf16.mxu1 %v465_v0  ;;  %391 = vmatprep.mubr.msk.bf16.mxu1 %vm466_vm0, %v465_v0  ;;  %v29_v5 = vld [vmem:[%s538_s0] sm:$0xf]  ;;  %v425_v7 = vld [vmem:[#allocation2 + $0x28] sm:$0xff]   ;;  %v426_v8 = vld [vmem:[#allocation2 + $0x30] sm:$0xff]  }
  0x15   :  { %368 = vmatpush3.bf16.msra.mxu0 %v420_v1  ;;  %376 = vmatpush3.bf16.msra.mxu1 %v422_v3  ;;  %v427_v9 = vld [vmem:[#allocation2 + $0x38] sm:$0xff]   ;;  %v428_v10 = vld [vmem:[#allocation2 + $0x40] sm:$0xff]   ;;  %v429_v11 = vld [vmem:[#allocation2 + $0x48] sm:$0xff]  }
  0x16   :  { %369 = vmatprep.subr.bf16.mxu0 %v465_v0  ;;  %377 = vmatprep.subr.bf16.mxu1 %v465_v0  ;;  %v430_v12 = vld [vmem:[#allocation2 + $0x50] sm:$0xff]   ;;  %v431_v13 = vld [vmem:[#allocation2 + $0x58] sm:$0xff]   ;;  %v432_v14 = vld [vmem:[#allocation2 + $0x60] sm:$0xff]  }
  0x17   :  { %v433_v15 = vld [vmem:[#allocation2 + $0x68] sm:$0xff]   ;;  %v434_v16 = vld [vmem:[#allocation2 + $0x70] sm:$0xff]   ;;  %v435_v17 = vld [vmem:[#allocation2 + $0x78] sm:$0xff]  }
  0x18   :  { %v324_v18 = vld [vmem:[%s540_s2] ss:$0 sm:$0xff]  ;;  %v436_v26 = vld [vmem:[#allocation2 + $0x80] sm:$0xff]   ;;  %v437_v27 = vld [vmem:[#allocation2 + $0x88] sm:$0xff]  }
  0x19   :  { %370 = vmatpush3.bf16.msra.mxu0 %v421_v2  ;;  %378 = vmatpush3.bf16.msra.mxu1 %v423_v4  ;;  %v328_v28 = vld [vmem:[%s540_s2 + $0x1] ss:$0 sm:$0xff]  ;;  %v337_v36 = vld [vmem:[%s540_s2 + $0x2] ss:$0 sm:$0xff] }
  0x1a   :  { %395 = vmatprep.subr.bf16.mxu0 %v465_v0  ;;  %379 = vmatprep.subr.bf16.mxu1 %v465_v0 }
  0x1c   :  { %372 = vmatmul.mubr.msk.bf16.vlgmr.msra.gmra.mrb[0].mxu0 %vm85_vm1, %v29_v5 }
  0x1d   :  { %411 = vmatprep.mubr.msk.bf16.mxu0 %vm466_vm0, %v465_v0  ;;  %380 = vmatpush3.bf16.msra.mxu1 %v424_v6 }
  0x1e   :  { %381 = vmatprep.subr.bf16.mxu1 %v465_v0  ;;  %396 = vmatpush3.bf16.msra.mxu0 %v430_v12 }
  0x1f   :  { %397 = vmatprep.subr.bf16.mxu0 %v465_v0 }
  0x21   :  { %382 = vmatpush3.bf16.msra.mxu1 %v425_v7 }
  0x22   :  { %383 = vmatprep.subr.bf16.mxu1 %v465_v0  ;;  %398 = vmatpush3.bf16.msra.mxu0 %v431_v13 }
  0x23   :  { %399 = vmatprep.subr.bf16.mxu0 %v465_v0 }
  0x25   :  { %384 = vmatpush3.bf16.msra.mxu1 %v426_v8 }
  0x26   :  { %385 = vmatprep.subr.bf16.mxu1 %v465_v0  ;;  %400 = vmatpush3.bf16.msra.mxu0 %v432_v14 }
  0x27   :  { %401 = vmatprep.subr.bf16.mxu0 %v465_v0 }
  0x29   :  { %386 = vmatpush3.bf16.msra.mxu1 %v427_v9 }
  0x2a   :  { %387 = vmatprep.subr.bf16.mxu1 %v465_v0  ;;  %402 = vmatpush3.bf16.msra.mxu0 %v433_v15 }
  0x2b   :  { %403 = vmatprep.subr.bf16.mxu0 %v465_v0 }
  0x2d   :  { %388 = vmatpush3.bf16.msra.mxu1 %v428_v10 }
  0x2e   :  { %389 = vmatprep.subr.bf16.mxu1 %v465_v0  ;;  %404 = vmatpush3.bf16.msra.mxu0 %v434_v16 }
  0x2f   :  { %405 = vmatprep.subr.bf16.mxu0 %v465_v0 }
  0x31   :  { %390 = vmatpush3.bf16.msra.mxu1 %v429_v11 }
  0x32   :  { %406 = vmatpush3.bf16.msra.mxu0 %v435_v17 }
  0x33   :  { %407 = vmatprep.subr.bf16.mxu0 %v465_v0 }
  0x36   :  { %408 = vmatpush3.bf16.msra.mxu0 %v436_v26 }
  0x37   :  { %409 = vmatprep.subr.bf16.mxu0 %v465_v0 }
  0x3a   :  { %410 = vmatpush3.bf16.msra.mxu0 %v437_v27 }
  0xef   :  { %v123_v19 = vpop.f32.mrb[0].mxu0 }
  0xf0   :  { %v124_v20 = vadd.f32 %v324_v18, %v123_v19  ;;  %v373_v21 = vpop.f32.mrb[1].mxu0 }
  0xf1   :  { %v126_v22 = vpop.f32.mrb[2].mxu0 }
  0xf2   :  { %v129_v23 = vmax.f32 %v124_v20, 0.0  ;;  %v374_v24 = vpop.f32.mrb[3].mxu0 }
  0xf4   :  { %v130_v25 = vpack.c.bf16 %v129_v23, %v129_v23 }
  0xf6   :  { %392 = vmatmul.mubr.bf16.vlgmr.msra.gmra.mrb[0].mxu1 %v130_v25 }
 0x1c9   :  { %v217_v29 = vpop.f32.mrb[0].mxu1 }
 0x1ca   :  { %v218_v30 = vadd.f32 %v328_v28, %v217_v29  ;;  %v393_v31 = vpop.f32.mrb[1].mxu1 }
 0x1cb   :  { %v220_v32 = vpop.f32.mrb[2].mxu1 }
 0x1cc   :  { %v223_v33 = vmax.f32 %v218_v30, 0.0  ;;  %v394_v34 = vpop.f32.mrb[3].mxu1 }
 0x1ce   :  { %v224_v35 = vpack.c.bf16 %v223_v33, %v223_v33 }
 0x1d0   :  { %412 = vmatmul.mubr.bf16.vlgmr.msra.gmra.mrb[4].mxu0 %v224_v35 }
 0x2a3   :  { %v311_v37 = vpop.f32.mrb[4].mxu0 }
 0x2a4   :  { %v312_v38 = vadd.f32 %v337_v36, %v311_v37  ;;  %v413_v39 = vpop.f32.mrb[5].mxu0 }
 0x2a5   :  { %v314_v40 = vpop.f32.mrb[6].mxu0 }
 0x2a6   :  { %318 = vst.msk [vmem:[%s541_s3] sm:$0xff] %vm317_vm2, %v312_v38  ;;  %v414_v41 = vpop.f32.mrb[7].mxu0 }
 0x2a7   :  { %323 = vsyncpa [#allocation3], 1 }

</bundles_post_ra>
